<compile_context>
chip_gen: v5e
topology: v5e:2x2
jax: 0.10.0
libtpu: 0.0.40
codegen_flags: <defaults>
</compile_context>

<pallas_src>
import math
import jax
import jax.numpy as jnp
from jax.experimental import pallas as pl
from jax.experimental.pallas import tpu as pltpu


def _adaptive_scale_kernel(x_ref, cond_ref, w_ref, b_ref, o_ref):
    # One row-tile of the flattened (b*t, ...) activations per grid step.
    x = x_ref[...]                              # (rows_blk, dim)
    cond = cond_ref[...]                        # (rows_blk, dim_cond)
    w = w_ref[...]                              # (dim_cond, dim)   (resident)
    b = b_ref[...]                              # (1, dim)          (resident)

    # scale = cond @ W + b   (single MXU matmul over all rows of the tile,
    # f32 accumulation regardless of input dtype)
    scale = jnp.dot(cond, w, preferred_element_type=jnp.float32) + b.astype(jnp.float32)

    # out = x * scale (VPU elementwise), fused — no intermediate in HBM.
    o_ref[...] = (x.astype(jnp.float32) * scale).astype(o_ref.dtype)


def adaptive_scale_proj(x, cond, w, b, *, block_rows=None):
    """x: (batch, seq, dim); cond: (batch, seq, dim_cond);
    w: (dim_cond, dim) [pre-transposed nn.Linear weight]; b: (dim,)."""
    batch, seq, dim = x.shape
    dim_cond = cond.shape[-1]
    rows = batch * seq

    # Fold batch into rows: one grid step handles the whole (small) batch.
    x2 = x.reshape(rows, dim)
    c2 = cond.reshape(rows, dim_cond)
    b2 = b.reshape(1, dim)

    if block_rows is None:
        # Single grid step whenever it comfortably fits VMEM; otherwise tile
        # rows in sublane-aligned chunks (multiple of 8).
        if rows <= 2048:
            block_rows = rows
        else:
            block_rows = 1024
    if block_rows < rows:
        block_rows = max(8, (block_rows // 8) * 8)
    grid = (pl.cdiv(rows, block_rows),)

    bpe = jnp.dtype(x.dtype).itemsize
    cost = pl.CostEstimate(
        flops=2 * rows * dim_cond * dim + 2 * rows * dim,
        transcendentals=0,
        bytes_accessed=(x2.size * bpe + c2.size * jnp.dtype(cond.dtype).itemsize
                        + w.size * jnp.dtype(w.dtype).itemsize
                        + b2.size * jnp.dtype(b.dtype).itemsize
                        + rows * dim * bpe),
    )

    out = pl.pallas_call(
        _adaptive_scale_kernel,
        out_shape=jax.ShapeDtypeStruct((rows, dim), x.dtype),
        grid_spec=pltpu.PrefetchScalarGridSpec(
            num_scalar_prefetch=0,
            grid=grid,
            in_specs=[
                pl.BlockSpec((block_rows, dim), lambda i: (i, 0)),       # x rows
                pl.BlockSpec((block_rows, dim_cond), lambda i: (i, 0)),  # cond rows
                pl.BlockSpec((dim_cond, dim), lambda i: (0, 0)),         # W (resident)
                pl.BlockSpec((1, dim), lambda i: (0, 0)),                # bias (resident)
            ],
            out_specs=pl.BlockSpec((block_rows, dim), lambda i: (i, 0)),
        ),
        compiler_params=pltpu.CompilerParams(
            dimension_semantics=("parallel",)),
        cost_estimate=cost,
    )(x2, c2, w, b2)

    return out.reshape(batch, seq, dim)


def reference_adaptive_scale_proj(x, cond, w, b):
    """Pure-JAX reference matching the PyTorch module: x * (Linear(cond))."""
    scale = cond @ w + b
    return x * scale


if __name__ == "__main__":
    # Module config (small shapes): dim=32, dim_cond=16, batch=2, seq=8
    batch, seq, dim, dim_cond = 2, 8, 32, 16

    key = jax.random.PRNGKey(0)
    kx, kc, kw, kb = jax.random.split(key, 4)

    x = jax.random.normal(kx, (batch, seq, dim), dtype=jnp.float32)
    cond = jax.random.normal(kc, (batch, seq, dim_cond), dtype=jnp.float32)

    # nn.Linear-like uniform init, stored as (in_dim, out_dim) so the kernel
    # computes cond @ W, matching torch's cond @ W^T.
    # (The module's reset_parameters() zeros W and b — that would make every
    #  output zero, so random init is used here to actually test numerics.)
    bound = 1.0 / math.sqrt(dim_cond)
    w = jax.random.uniform(kw, (dim_cond, dim), jnp.float32, -bound, bound)
    b = jax.random.uniform(kb, (dim,), jnp.float32, -bound, bound)

    out = adaptive_scale_proj(x, cond, w, b)
    out = jax.block_until_ready(out)

    ref = reference_adaptive_scale_proj(x, cond, w, b)
    assert out.shape == (batch, seq, dim)
    assert jnp.allclose(out, ref, atol=1e-5, rtol=1e-5), "mismatch vs reference"

    print("KERNEL_OK")
</pallas_src>

<mosaic_0001>
module attributes {stable_mosaic.version = 11 : i64} {
  func.func @_adaptive_scale_kernel(%arg0: i32, %arg1: memref<16x32xf32, #tpu.memory_space<vmem>>, %arg2: memref<16x16xf32, #tpu.memory_space<vmem>>, %arg3: memref<16x32xf32, #tpu.memory_space<vmem>>, %arg4: memref<1x32xf32, #tpu.memory_space<vmem>>, %arg5: memref<16x32xf32, #tpu.memory_space<vmem>>) attributes {dimension_semantics = [#tpu.dimension_semantics<parallel>], iteration_bounds = array<i64: 1>, scalar_prefetch = 0 : i64, scratch_operands = 0 : i64, tpu.core_type = #tpu.core_type<tc>, window_params = [{transform_indices = @transform_0, window_bounds = array<i64: 16, 32>}, {transform_indices = @transform_1, window_bounds = array<i64: 16, 16>}, {pipeline_mode = #tpu.pipeline_mode<synchronous>, transform_indices = @transform_2, window_bounds = array<i64: 16, 32>}, {pipeline_mode = #tpu.pipeline_mode<synchronous>, transform_indices = @transform_3, window_bounds = array<i64: 1, 32>}, {transform_indices = @transform_4, window_bounds = array<i64: 16, 32>}]} {
    %c0 = arith.constant 0 : index
    %c0_0 = arith.constant 0 : index
    %0 = vector.load %arg1[%c0, %c0_0] : memref<16x32xf32, #tpu.memory_space<vmem>>, vector<16x32xf32>
    %c0_1 = arith.constant 0 : index
    %c0_2 = arith.constant 0 : index
    %1 = vector.load %arg2[%c0_1, %c0_2] : memref<16x16xf32, #tpu.memory_space<vmem>>, vector<16x16xf32>
    %c0_3 = arith.constant 0 : index
    %c0_4 = arith.constant 0 : index
    %2 = vector.load %arg3[%c0_3, %c0_4] : memref<16x32xf32, #tpu.memory_space<vmem>>, vector<16x32xf32>
    %c0_5 = arith.constant 0 : index
    %c0_6 = arith.constant 0 : index
    %3 = vector.load %arg4[%c0_5, %c0_6] : memref<1x32xf32, #tpu.memory_space<vmem>>, vector<1x32xf32>
    %cst = arith.constant dense<0.000000e+00> : vector<16x32xf32>
    %4 = tpu.matmul %1, %2, %cst {dimension_numbers = #tpu.dot_dimension_numbers<[1], [0], [0], [1], [0, 0, 1, 1], [], []>} : vector<16x16xf32>, vector<16x32xf32>, vector<16x32xf32> -> vector<16x32xf32>
    %5 = vector.broadcast %3 : vector<1x32xf32> to vector<16x32xf32>
    %6 = arith.addf %4, %5 : vector<16x32xf32>
    %7 = arith.mulf %0, %6 : vector<16x32xf32>
    %c0_7 = arith.constant 0 : index
    %c0_8 = arith.constant 0 : index
    %8 = vector.load %arg5[%c0_7, %c0_8] : memref<16x32xf32, #tpu.memory_space<vmem>>, vector<16x32xf32>
    tpu.vector_store %arg5[%c0_7, %c0_8], %7 {strides = array<i32>} : memref<16x32xf32, #tpu.memory_space<vmem>>, vector<16x32xf32>,
    return
  }
  func.func @transform_0(%arg0: i32) -> (i32, i32) {
    %c0_i32 = arith.constant 0 : i32
    %c0_i32_0 = arith.constant 0 : i32
    return %arg0, %c0_i32 : i32, i32
  }
  func.func @transform_1(%arg0: i32) -> (i32, i32) {
    %c0_i32 = arith.constant 0 : i32
    %c0_i32_0 = arith.constant 0 : i32
    return %arg0, %c0_i32 : i32, i32
  }
  func.func @transform_2(%arg0: i32) -> (i32, i32) {
    %c0_i32 = arith.constant 0 : i32
    %c0_i32_0 = arith.constant 0 : i32
    %c0_i32_1 = arith.constant 0 : i32
    return %c0_i32, %c0_i32_0 : i32, i32
  }
  func.func @transform_3(%arg0: i32) -> (i32, i32) {
    %c0_i32 = arith.constant 0 : i32
    %c0_i32_0 = arith.constant 0 : i32
    %c0_i32_1 = arith.constant 0 : i32
    return %c0_i32, %c0_i32_0 : i32, i32
  }
  func.func @transform_4(%arg0: i32) -> (i32, i32) {
    %c0_i32 = arith.constant 0 : i32
    %c0_i32_0 = arith.constant 0 : i32
    return %arg0, %c0_i32 : i32, i32
  }
}

</mosaic_0001>

<bundles_post_ra>
// kernel: tpu_custom_call.1
= control target key start
LH: loop header
LB: loop body
LE: loop exit
PB: predicated region body
PF: predicated region fallthrough
CT: control target
= control target key end

     0   :  { %9 = vsyncpa [#allocation3], 0  ;;  %s301_s0 = inlined_call_operand.hbm [shape: f32[16,32], index: 0, kind: input, shape index: {}]   ;;  %s302_s1 = inlined_call_operand.hbm [shape: f32[16,16], index: 1, kind: input, shape index: {}]   ;;  %s303_s2 = inlined_call_operand.hbm [shape: f32[16,32], index: 2, kind: input, shape index: {}]   ;;  %s304_s3 = inlined_call_operand.vmem [shape: f32[1,32], index: 3, kind: input, shape index: {}]   ;;  %s305_s4 = inlined_call_operand.hbm [shape: f32[16,32], index: 4, kind: output, shape index: {}]  }
   0x1   :  { %10 = vsyncpa [#allocation6], 0 }
   0x2   :  { %11 = vsyncpa [#allocation4], 0  ;;  %s29_s17 = sshll.u32 %s302_s1, 4  ;;  %s243_s18 = smov [#allocation5]   ;;  %s30_s17 = int_to_ptr.hbm [resolvable:$true] %s29_s17 }
   0x3   :  { %s31_s19 = sshll.u32 %s243_s18, 4  ;;  %s16_s22 = sshll.u32 %s301_s0, 4  ;;  %s32_s19 = int_to_ptr.vmem [resolvable:$true] %s31_s19  ;;  %s17_s22 = int_to_ptr.hbm [resolvable:$true] %s16_s22 }
   0x4   :  { %s244_s23 = smov 128   ;;  %s245_s24 = smov 8  }
   0x5   :  { %37 = dma.hbm_to_vmem [thread:$0]  %s30_s17, 256, %s32_s19, [#allocation6], %s244_s23, %s244_s23, %s245_s24  }
   0x6   :  { %s246_s25 = smov [#allocation2]   ;;  %s42_s1 = sshll.u32 %s303_s2, 4  ;;  %s43_s1 = int_to_ptr.hbm [resolvable:$true] %s42_s1 }
   0x7   :  { %s18_s26 = sshll.u32 %s246_s25, 4  ;;  %s247_s0 = smov [#allocation7]   ;;  %s19_s26 = int_to_ptr.vmem [resolvable:$true] %s18_s26 }
   0x8   :  { %24 = dma.hbm_to_vmem [thread:$0]  %s17_s22, 256, %s19_s26, [#allocation3], %s244_s23, %s244_s23, %s245_s24  }
   0x9   :  { %s44_s29 = sshll.u32 %s247_s0, 4  ;;  %s45_s29 = int_to_ptr.vmem [resolvable:$true] %s44_s29 }
   0xa   :  { %50 = dma.hbm_to_vmem [thread:$0]  %s43_s1, 256, %s45_s29, [#allocation6], %s244_s23, %s244_s23, %s245_s24  }
   0xb   :  { %237 = dma.done.wait [#allocation3], 256  }
   0xc   :  { %238 = vsyncadd [#allocation3], 4294967040 }
   0xd   :  { %239 = dma.done.wait [#allocation6], 512  }
   0xe   :  { %240 = vsyncadd [#allocation6], 4294966784  ;;  %v70_v0 = vld [vmem:[#allocation7 + $0x8] sm:$0xff]  ;;  %v69_v1 = vld [vmem:[#allocation7] sm:$0xff]  ;;  %vm75_vm0 = vcmask 130048   ;;  %s248_s5 = smov [#allocation8]  }
   0xf   :  { %96 = vmatpush.msra.mxu0 %v70_v0  ;;  %132 = vmatpush.msra.mxu1 %v70_v0  ;;  %v67_v2 = vld [vmem:[#allocation5] sm:$0xff]  ;;  %v68_v3 = vld [vmem:[#allocation5 + $0x8] sm:$0xff]  ;;  %v140_v4 = vld [vmem:[%s304_s3] ss:$0 sm:$0xff]  ;;  %s114_s6 = sshll.u32 %s248_s5, 4  ;;  %s116_s9 = sshll.u32 %s305_s4, 4  ;;  %s115_s6 = int_to_ptr.vmem [resolvable:$true] %s114_s6  ;;  %s117_s9 = int_to_ptr.hbm [resolvable:$true] %s116_s9 }
  0x10   :  { %v65_v5 = vld [vmem:[#allocation2] sm:$0xff]  ;;  %v66_v7 = vld [vmem:[#allocation2 + $0x8] sm:$0xff]  ;;  %vm107_vm1 = vcmask 261120  }
  0x11   :  { %97 = vmatpush.msra.mxu0 %v69_v1  ;;  %133 = vmatpush.msra.mxu1 %v69_v1 }
  0x12   :  { %130 = vmatmul.msk.f32.vlgmr.msra.gmra.mxu0 %vm75_vm0, %v67_v2  ;;  %131 = vmatmul.msk.f32.vlgmr.msra.gmra.mxu1 %vm75_vm0, %v68_v3 }
  0x8f   :  { %v99_v6 = vpop.f32.mrf.mxu0  ;;  %v102_v8 = vpop.f32.mrf.mxu1 }
  0x90   :  { %v100_v9 = vadd.f32 %v140_v4, %v99_v6  ;;  %v103_v10 = vadd.f32 %v140_v4, %v102_v8 }
  0x92   :  { %v105_v11 = vmul.f32 %v100_v9, %v65_v5  ;;  %v106_v12 = vmul.f32 %v103_v10, %v66_v7 }
  0x94   :  { %108 = vst.msk [vmem:[#allocation8] sm:$0xff] %vm107_vm1, %v105_v11 }
  0x95   :  { %109 = vst.msk [vmem:[#allocation8 + $0x8] sm:$0xff] %vm107_vm1, %v106_v12 }
  0x96   :  { %122 = dma.vmem_to_hbm [thread:$0]  %s115_s6, 256, %s117_s9, [#allocation4], %s244_s23, %s244_s23, %s245_s24  }
  0x97   :  { %241 = dma.done.wait [#allocation4], 256  }
  0x98   :  { %242 = vsyncadd [#allocation4], 4294967040 }
  0x99   :  { %127 = vsyncpa [#allocation3], 1 }
  0x9a   :  { %128 = vsyncpa [#allocation6], 1 }
  0x9b   :  { %129 = vsyncpa [#allocation4], 1 }

</bundles_post_ra>
